<compile_context>
chip_gen: v7x
topology: tpu7x:2x2x1
jax: 0.10.0
libtpu: 0.0.40
codegen_flags: <defaults>
</compile_context>

<pallas_src>
import functools

import jax
import jax.numpy as jnp
from jax import lax
from jax.experimental import pallas as pl
from jax.experimental.pallas import tpu as pltpu

_SW = 128                                   # inner lane-slice width (one vreg of lanes)
_DEFAULT_BLOCK_BYTES = 5 * 1024 * 1024      # streamed bytes per grid step (per operand set)


def _round_up(x, m):
    return (x + m - 1) // m * m


def _cdiv(a, b):
    return (a + b - 1) // b


def _sublane_rows(itemsize):
    # physical sublane rounding of the second-minor dim (f32:8, bf16:16, int8:32)
    return max(8, 32 // max(1, itemsize))


def _choose_thw(bytes_per_lane, hw, budget_bytes):
    """Spatial chunk width: a multiple of 128 so streamed bytes/step ~= budget."""
    lanes = max(_SW, (budget_bytes // max(1, bytes_per_lane)) // _SW * _SW)
    hw128 = _round_up(hw, _SW)
    if lanes >= hw128:
        return hw128                      # one chunk covers all of HW
    n_chunks = _cdiv(hw128, lanes)
    return _round_up(_cdiv(hw, n_chunks), _SW)   # balanced chunks, multiple of 128


def _accumulate_chunk(acc_ref, prod_slice, *, h, hw, thw, n_hw):
    """acc_ref[(rows, 128)] += sum of the valid 128-lane slices of this chunk.

    prod_slice(off) -> (rows, 128) float32 contribution for lanes [off, off+128)
    of the current chunk.  Trip counts are static; garbage lanes of a ragged
    last chunk are zeroed with an iota mask (safe even if the unspecified
    out-of-bounds lanes hold NaN/Inf) and fully-invalid slices are skipped.
    """
    full_slices = thw // _SW
    last_valid = hw - (n_hw - 1) * thw          # 1 .. thw
    last_full = last_valid // _SW
    last_rem = last_valid % _SW

    def run(nfull, rem):
        if nfull > 0:
            def body(i, carry):
                off = pl.multiple_of(i * _SW, _SW)
                acc_ref[...] += prod_slice(off)
                return carry
            lax.fori_loop(0, nfull, body, 0, unroll=min(nfull, 8))
        if rem > 0:
            off = nfull * _SW
            lane = lax.broadcasted_iota(jnp.int32, (1, _SW), 1)
            acc_ref[...] += jnp.where(lane < rem, prod_slice(off), 0.0)

    if n_hw == 1:
        run(last_full, last_rem)
    elif last_full == full_slices and last_rem == 0:        # HW % THW == 0
        run(full_slices, 0)
    else:
        @pl.when(h < n_hw - 1)
        def _():
            run(full_slices, 0)

        @pl.when(h == n_hw - 1)
        def _():
            run(last_full, last_rem)


def _mean_kernel(feat_ref, out_ref, acc_ref, *, hw, thw, n_hw, inv_hw):
    # feat (1, TC, THW); out (1, TC, 1); acc (TC, 128) f32
    h = pl.program_id(2)

    @pl.when(h == 0)
    def _():
        acc_ref[...] = jnp.zeros_like(acc_ref)

    def prod(off):
        return feat_ref[0, :, pl.ds(off, _SW)].astype(jnp.float32)

    _accumulate_chunk(acc_ref, prod, h=h, hw=hw, thw=thw, n_hw=n_hw)

    @pl.when(h == n_hw - 1)
    def _():
        s = jnp.sum(acc_ref[...], axis=-1, keepdims=True)   # (TC, 1), epilogue-only
        out_ref[0] = (s * inv_hw).astype(out_ref.dtype)


def _masked_mean_kernel(feat_ref, mask_ref, out_ref, acc_ref, *, hw, thw, n_hw, inv_hw):
    # feat (1, TC, THW); mask (1, MC, THW) with MC in {1, TC}; out (1, TC, 1)
    h = pl.program_id(2)

    @pl.when(h == 0)
    def _():
        acc_ref[...] = jnp.zeros_like(acc_ref)

    def prod(off):
        f = feat_ref[0, :, pl.ds(off, _SW)].astype(jnp.float32)
        m = mask_ref[0, :, pl.ds(off, _SW)].astype(jnp.float32)
        return f * m     # (1, 128) spatial mask broadcasts over channel sublanes

    _accumulate_chunk(acc_ref, prod, h=h, hw=hw, thw=thw, n_hw=n_hw)

    @pl.when(h == n_hw - 1)
    def _():
        s = jnp.sum(acc_ref[...], axis=-1, keepdims=True)
        out_ref[0] = (s * inv_hw).astype(out_ref.dtype)


def masked_max_pooling(feat, mask=None, size=1, *, block_bytes=None):
    """feat: (N, C, H, W); mask: None or broadcastable to feat (typically (N,1,H,W)).
    Returns (N, C, 1, 1) = AdaptiveAvgPool2d(1)(feat * mask)."""
    # TODO(synk): AdaptiveAvgPool2d with output size > 1 is not implemented.
    assert size == 1, "only AdaptiveAvgPool2d(1) semantics are implemented"
    N, C, H, W = feat.shape
    HW = H * W
    dtype = feat.dtype
    f_item = jnp.dtype(dtype).itemsize
    inv_hw = 1.0 / float(HW)
    budget = _DEFAULT_BLOCK_BYTES if block_bytes is None else int(block_bytes)

    m = None
    if mask is not None:
        m = jnp.asarray(mask)
        if m.ndim < 4:
            m = m.reshape((1,) * (4 - m.ndim) + m.shape)
        if not jnp.issubdtype(m.dtype, jnp.floating):
            m = m.astype(jnp.float32)

    spatial = (m is not None) and (m.shape[1] == 1)       # per-sample spatial mask
    per_channel = (m is not None) and (m.shape[1] != 1)   # full per-channel mask

    # Channel tile: bound vreg pressure of the (TC, 128) compute slices.
    tc_cap = 64 if per_channel else 128
    TC = C if C <= tc_cap else tc_cap
    n_c = _cdiv(C, TC)

    # Streamed bytes per lane column (physical, sublane-padded) -> chunk width.
    bytes_per_lane = _round_up(TC, _sublane_rows(f_item)) * f_item
    if m is not None:
        m_item = jnp.dtype(m.dtype).itemsize
        m_rows = _sublane_rows(m_item) if spatial else _round_up(TC, _sublane_rows(m_item))
        bytes_per_lane += m_rows * m_item
    THW = _choose_thw(bytes_per_lane, HW, budget)
    n_hw = _cdiv(HW, THW)

    grid = (N, n_c, n_hw)
    feat_spec = pl.BlockSpec((1, TC, THW), lambda n, c, h: (n, c, h))
    out_spec = pl.BlockSpec((1, TC, 1), lambda n, c, h: (n, c, 0))
    out_shape = jax.ShapeDtypeStruct((N, C, 1), dtype)
    scratch = [pltpu.VMEM((TC, _SW), jnp.float32)]
    cparams = pltpu.CompilerParams(
        dimension_semantics=("parallel", "parallel", "arbitrary"))

    feat_r = feat.reshape(N, C, HW)
    common = dict(hw=HW, thw=THW, n_hw=n_hw, inv_hw=inv_hw)

    if m is None:
        out = pl.pallas_call(
            functools.partial(_mean_kernel, **common),
            out_shape=out_shape,
            grid_spec=pltpu.PrefetchScalarGridSpec(
                num_scalar_prefetch=0, grid=grid,
                in_specs=[feat_spec], out_specs=out_spec,
                scratch_shapes=scratch),
            compiler_params=cparams,
        )(feat_r)
    else:
        if spatial:
            mask_r = jnp.broadcast_to(m, (N, 1, H, W)).reshape(N, 1, HW)
            mask_spec = pl.BlockSpec((1, 1, THW), lambda n, c, h: (n, 0, h))
        else:
            mask_r = jnp.broadcast_to(m, (N, C, H, W)).reshape(N, C, HW)
            mask_spec = pl.BlockSpec((1, TC, THW), lambda n, c, h: (n, c, h))
        out = pl.pallas_call(
            functools.partial(_masked_mean_kernel, **common),
            out_shape=out_shape,
            grid_spec=pltpu.PrefetchScalarGridSpec(
                num_scalar_prefetch=0, grid=grid,
                in_specs=[feat_spec, mask_spec], out_specs=out_spec,
                scratch_shapes=scratch),
            compiler_params=cparams,
        )(feat_r, mask_r)

    return out.reshape(N, C, 1, 1)


if __name__ == "__main__":
    key = jax.random.PRNGKey(0)
    ks = jax.random.split(key, 8)

    def check(feat, mask, **kw):
        out = jax.block_until_ready(masked_max_pooling(feat, mask, **kw))
        f = feat.astype(jnp.float32)
        if mask is not None:
            f = f * jnp.broadcast_to(mask.astype(jnp.float32), f.shape)
        ref = jnp.mean(f, axis=(2, 3), keepdims=True)
        assert out.shape == ref.shape, (out.shape, ref.shape)
        assert jnp.allclose(out.astype(jnp.float32), ref, atol=1e-4, rtol=1e-4)

    # primary shape implied by the module (spatial saliency mask, 1 channel)
    feat = jax.random.normal(ks[0], (2, 4, 16, 16), dtype=jnp.float32)
    mask = (jax.random.uniform(ks[1], (2, 1, 16, 16)) > 0.5).astype(jnp.float32)
    check(feat, mask)
    check(feat, None)

    # full per-channel mask (mask.expand_as(feat) with an explicit channel dim)
    mask_full = (jax.random.uniform(ks[2], (2, 4, 16, 16)) > 0.5).astype(jnp.float32)
    check(feat, mask_full)

    # ragged spatial size (7x7 = 49): exercises the in-kernel lane masking
    feat2 = jax.random.normal(ks[3], (2, 8, 7, 7), dtype=jnp.float32)
    mask2 = (jax.random.uniform(ks[4], (2, 1, 7, 7)) > 0.5).astype(jnp.float32)
    check(feat2, mask2)
    check(feat2, None)

    # C > 128: partial channel tile + ragged HW
    feat3 = jax.random.normal(ks[5], (2, 160, 12, 12), dtype=jnp.float32)
    mask3 = (jax.random.uniform(ks[6], (2, 1, 12, 12)) > 0.5).astype(jnp.float32)
    check(feat3, mask3)

    # force a multi-chunk reduction (n_hw > 1) with a small per-step budget
    feat4 = jax.random.normal(ks[7], (2, 16, 30, 30), dtype=jnp.float32)
    mask4 = (jax.random.uniform(ks[1], (2, 1, 30, 30)) > 0.5).astype(jnp.float32)
    mask4c = (jax.random.uniform(ks[2], (2, 16, 30, 30)) > 0.5).astype(jnp.float32)
    check(feat4, mask4, block_bytes=64 * 1024)
    check(feat4, mask4c, block_bytes=64 * 1024)
    check(feat4, None, block_bytes=64 * 1024)

    print("KERNEL_OK")
</pallas_src>

<mosaic_0001>
module attributes {stable_mosaic.version = 11 : i64} {
  func.func @_masked_mean_kernel(%arg0: i32, %arg1: i32, %arg2: i32, %arg3: memref<1x4x256xf32, #tpu.memory_space<vmem>>, %arg4: memref<1x1x256xf32, #tpu.memory_space<vmem>>, %arg5: memref<1x4x1xf32, #tpu.memory_space<vmem>>, %arg6: memref<4x128xf32, #tpu.memory_space<vmem>>) attributes {dimension_semantics = [#tpu.dimension_semantics<parallel>, #tpu.dimension_semantics<parallel>, #tpu.dimension_semantics<arbitrary>], iteration_bounds = array<i64: 2, 1, 1>, scalar_prefetch = 0 : i64, scratch_operands = 1 : i64, tpu.core_type = #tpu.core_type<tc>, window_params = [{transform_indices = @transform_0, window_bounds = array<i64: 1, 4, 256>}, {transform_indices = @transform_1, window_bounds = array<i64: 1, 1, 256>}, {transform_indices = @transform_2, window_bounds = array<i64: 1, 4, 1>}]} {
    %c0_i32 = arith.constant 0 : i32
    %0 = arith.cmpi eq, %arg2, %c0_i32 : i32
    %1 = arith.extui %0 : i1 to i32
    %c0_i32_0 = arith.constant 0 : i32
    %2 = arith.cmpi ne, %1, %c0_i32_0 : i32
    scf.if %2 {
      %cst = arith.constant 0.000000e+00 : f32
      %32 = vector.broadcast %cst : f32 to vector<4x128xf32>
      %c0_20 = arith.constant 0 : index
      %c0_21 = arith.constant 0 : index
      %33 = vector.load %arg6[%c0_20, %c0_21] : memref<4x128xf32, #tpu.memory_space<vmem>>, vector<4x128xf32>
      tpu.vector_store %arg6[%c0_20, %c0_21], %32 {strides = array<i32>} : memref<4x128xf32, #tpu.memory_space<vmem>>, vector<4x128xf32>,
    } else {
    }
    %c0_i32_1 = arith.constant 0 : i32
    %c128_i32 = arith.constant 128 : i32
    %3 = arith.muli %c0_i32_1, %c128_i32 : i32
    %4 = tpu.assume_multiple %3, 128 : i32
    %c0 = arith.constant 0 : index
    %c0_2 = arith.constant 0 : index
    %5 = vector.load %arg6[%c0, %c0_2] : memref<4x128xf32, #tpu.memory_space<vmem>>, vector<4x128xf32>
    %c0_3 = arith.constant 0 : index
    %c0_4 = arith.constant 0 : index
    %6 = arith.index_cast %4 : i32 to index
    %7 = vector.load %arg3[%c0_3, %c0_4, %6] : memref<1x4x256xf32, #tpu.memory_space<vmem>>, vector<1x4x128xf32>
    %8 = vector.shape_cast %7 : vector<1x4x128xf32> to vector<4x128xf32>
    %c0_5 = arith.constant 0 : index
    %c0_6 = arith.constant 0 : index
    %9 = arith.index_cast %4 : i32 to index
    %10 = vector.load %arg4[%c0_5, %c0_6, %9] : memref<1x1x256xf32, #tpu.memory_space<vmem>>, vector<1x1x128xf32>
    %11 = vector.shape_cast %10 : vector<1x1x128xf32> to vector<1x128xf32>
    %12 = vector.broadcast %11 : vector<1x128xf32> to vector<4x128xf32>
    %13 = arith.mulf %8, %12 : vector<4x128xf32>
    %14 = arith.addf %5, %13 : vector<4x128xf32>
    %c0_7 = arith.constant 0 : index
    %c0_8 = arith.constant 0 : index
    %15 = vector.load %arg6[%c0_7, %c0_8] : memref<4x128xf32, #tpu.memory_space<vmem>>, vector<4x128xf32>
    tpu.vector_store %arg6[%c0_7, %c0_8], %14 {strides = array<i32>} : memref<4x128xf32, #tpu.memory_space<vmem>>, vector<4x128xf32>,
    %c1_i32 = arith.constant 1 : i32
    %c128_i32_9 = arith.constant 128 : i32
    %16 = arith.muli %c1_i32, %c128_i32_9 : i32
    %17 = tpu.assume_multiple %16, 128 : i32
    %c0_10 = arith.constant 0 : index
    %c0_11 = arith.constant 0 : index
    %18 = vector.load %arg6[%c0_10, %c0_11] : memref<4x128xf32, #tpu.memory_space<vmem>>, vector<4x128xf32>
    %c0_12 = arith.constant 0 : index
    %c0_13 = arith.constant 0 : index
    %19 = arith.index_cast %17 : i32 to index
    %20 = vector.load %arg3[%c0_12, %c0_13, %19] : memref<1x4x256xf32, #tpu.memory_space<vmem>>, vector<1x4x128xf32>
    %21 = vector.shape_cast %20 : vector<1x4x128xf32> to vector<4x128xf32>
    %c0_14 = arith.constant 0 : index
    %c0_15 = arith.constant 0 : index
    %22 = arith.index_cast %17 : i32 to index
    %23 = vector.load %arg4[%c0_14, %c0_15, %22] : memref<1x1x256xf32, #tpu.memory_space<vmem>>, vector<1x1x128xf32>
    %24 = vector.shape_cast %23 : vector<1x1x128xf32> to vector<1x128xf32>
    %25 = vector.broadcast %24 : vector<1x128xf32> to vector<4x128xf32>
    %26 = arith.mulf %21, %25 : vector<4x128xf32>
    %27 = arith.addf %18, %26 : vector<4x128xf32>
    %c0_16 = arith.constant 0 : index
    %c0_17 = arith.constant 0 : index
    %28 = vector.load %arg6[%c0_16, %c0_17] : memref<4x128xf32, #tpu.memory_space<vmem>>, vector<4x128xf32>
    tpu.vector_store %arg6[%c0_16, %c0_17], %27 {strides = array<i32>} : memref<4x128xf32, #tpu.memory_space<vmem>>, vector<4x128xf32>,
    %c2_i32 = arith.constant 2 : i32
    %c0_i32_18 = arith.constant 0 : i32
    %29 = arith.cmpi eq, %arg2, %c0_i32_18 : i32
    %30 = arith.extui %29 : i1 to i32
    %c0_i32_19 = arith.constant 0 : i32
    %31 = arith.cmpi ne, %30, %c0_i32_19 : i32
    scf.if %31 {
      %c0_20 = arith.constant 0 : index
      %c0_21 = arith.constant 0 : index
      %32 = vector.load %arg6[%c0_20, %c0_21] : memref<4x128xf32, #tpu.memory_space<vmem>>, vector<4x128xf32>
      %cst = arith.constant dense<0.000000e+00> : vector<4xf32>
      %33 = vector.multi_reduction <add>, %32, %cst [1] : vector<4x128xf32> to vector<4xf32>
      %34 = vector.shape_cast %33 : vector<4xf32> to vector<4x1xf32>
      %cst_22 = arith.constant 3.906250e-03 : f32
      %35 = vector.broadcast %cst_22 : f32 to vector<4x1xf32>
      %36 = arith.mulf %34, %35 : vector<4x1xf32>
      %c0_23 = arith.constant 0 : index
      %c0_24 = arith.constant 0 : index
      %c0_25 = arith.constant 0 : index
      %37 = vector.load %arg5[%c0_23, %c0_24, %c0_25] : memref<1x4x1xf32, #tpu.memory_space<vmem>>, vector<1x4x1xf32>
      %38 = vector.shape_cast %37 : vector<1x4x1xf32> to vector<4x1xf32>
      %39 = vector.shape_cast %36 : vector<4x1xf32> to vector<1x4x1xf32>
      tpu.vector_store %arg5[%c0_23, %c0_24, %c0_25], %39 {strides = array<i32>} : memref<1x4x1xf32, #tpu.memory_space<vmem>>, vector<1x4x1xf32>,
    } else {
    }
    return
  }
  func.func @transform_0(%arg0: i32, %arg1: i32, %arg2: i32) -> (i32, i32, i32) {
    %c0_i32 = arith.constant 0 : i32
    return %arg0, %arg1, %arg2 : i32, i32, i32
  }
  func.func @transform_1(%arg0: i32, %arg1: i32, %arg2: i32) -> (i32, i32, i32) {
    %c0_i32 = arith.constant 0 : i32
    %c0_i32_0 = arith.constant 0 : i32
    return %arg0, %c0_i32, %arg2 : i32, i32, i32
  }
  func.func @transform_2(%arg0: i32, %arg1: i32, %arg2: i32) -> (i32, i32, i32) {
    %c0_i32 = arith.constant 0 : i32
    %c0_i32_0 = arith.constant 0 : i32
    return %arg0, %arg1, %c0_i32 : i32, i32, i32
  }
}

</mosaic_0001>

<bundles_post_ra>
// kernel: tpu_custom_call.1
= control target key start
LH: loop header
LB: loop body
LE: loop exit
PB: predicated region body
PF: predicated region fallthrough
CT: control target
= control target key end

     0   :  { %7 = vsyncpa [#allocation4], 0  ;;  %s781_s0 = inlined_call_operand.hbm [shape: f32[2,4,256], index: 0, kind: input, shape index: {}]   ;;  %s782_s1 = inlined_call_operand.hbm [shape: f32[2,1,256], index: 1, kind: input, shape index: {}]   ;;  %s783_s2 = inlined_call_operand.vmem [shape: f32[2,4,1], index: 2, kind: output, shape index: {}]  }
   0x1   :  { %9 = vsyncpa [#allocation4 + $0x1], 0 }
   0x2   :  { %10 = vsyncpa [#allocation6], 0 }
   0x3   :  { %12 = vsyncpa [#allocation6 + $0x1], 0  ;;  %s615_s9 = smov 0   ;;  %s617_s10 = smov 0  }
   0x4   :  { %s619_s11 = smov 0   ;;  %s621_s12 = smov 0  }
   0x5   :  { %s623_s13 = smov 0   ;;  %s625_s14 = smov 0  }
   0x6 LB: > { %s398_s15 = sadd.s32 4294967295, %s595_s14   ;;  %s37_s16 = sadd.s32 1, %s591_s13  ;;  %s595_s14 = sphi %s625_s14, %s18_s14   ;;  %s591_s13 = sphi %s623_s13, %s797_s13   ;;  %s587_s12 = sphi %s621_s12, %s796_s12   ;;  %s583_s11 = sphi %s619_s11, %s795_s11   ;;  %s579_s10 = sphi %s617_s10, %s794_s10   ;;  %s575_s9 = sphi %s615_s9, %s793_s9  }
   0x7   : > { %p39_p0 = scmp.ge.s32.totalorder %s37_s16, 2  ;;  %s48_s17 = sadd.s32 1, %s583_s11 }
   0x8   : > { %p55_p1 = scmp.ne.s32.totalorder %s583_s11, %s579_s10  ;;  %p56_p2 = scmp.eq.s32.totalorder %s595_s14, 0 }
   0x9   : > { %s799_s16 = smov (%p39_p0, %s37_s16), 0  ;;  %p61_p4 = scmp.ne.s32.totalorder %s579_s10, %s575_s9 }
   0xa   : > { %p651_p3 = por %p56_p2, %p55_p1  ;;  %s41_s19 = ssub.s32 %s591_s13, %s799_s16 }
   0xb   : > { %p62_p5 = scmp.eq.s32.totalorder %s398_s15, 0  ;;  %p46_p6 = scmp.eq.s32.totalorder %s41_s19, 0 }
   0xc   : > { %p431_p8 = scmp.lt.s32.totalorder %s595_s14, 2  ;;  %s667_s22 = sand.u32 1, %s583_s11  }
   0xd   : > { %p658_p7 = por %p62_p5, %p61_p4  ;;  %s418_s23 = sshll.u32 %s591_s13, 7 }
   0xe   : > { %s664_s21 = scalar_select %p46_p6, %s583_s11, %s48_s17  }
   0xf   : > { %s786_s20 = scalar_select %p658_p7, 1, 0 }
  0x10   : > { %s402_s24 = sshll.u32 %s667_s22, 3  ;;  %s674_s27 = scalar_lea.hbm %s781_s0, %s418_s23 }
  0x11   : > { %s145_s28 = scalar_lea.vmem [#allocation3], %s402_s24  ;;  %p678_p9 = pnand %p431_p8, %p651_p3 }
  0x12   : > { %s157_s29 = sshll.u32 %s145_s28, 4  ;;  %s142_s3 = scalar_lea.sflag [#allocation4], %s667_s22  ;;  %s682_s29 = int_to_ptr.vmem [resolvable:$true] %s157_s29 }
  0x13   : > { %s481_s4 = scalar_lea.hbm %s674_s27, 128  ;;  %p483_p13 = pneg %p678_p9 }
  0x14   : > { %p482_p12 = scmp.ne.s32.totalorder %s674_s27, %s481_s4  ;;  %s486_s7 = scalar_lea.hbm %s781_s0, 256 }
  0x15   : > { %p487_p2 = scmp.lt.u32.totalorder %s674_s27, %s781_s0  ;;  %p488_p3 = scmp.lt.u32.totalorder %s486_s7, %s481_s4 }
  0x16   : > { %p484_p0 = pnand %p483_p13, %p482_p12  ;;  %p490_p5 = scmp.lt.u32.totalorder %s481_s4, %s674_s27 }
  0x17   : > { %p489_p4 = por %p488_p3, %p487_p2 }
  0x18   : > { %p485_p1 = pneg %p484_p0 }
  0x19   : > { %p491_p6 = por %p490_p5, %p489_p4 }
  0x1b   : > { %p492_p8 = pnand %p491_p6, %p485_p1 }
  0x1d   : > { %495 = shalt.err (!%p492_p8)
}
  0x1e   : > { %s496_s15 = scalar_lea.vmem %s682_s29, 128  ;;  %s597_s17 = smov [#allocation3]  }
  0x1f   : > { %p497_p12 = scmp.ne.s32.totalorder %s682_s29, %s496_s15  ;;  %s501_s18 = sshll.u32 %s597_s17, 4  ;;  %s502_s18 = int_to_ptr.vmem [resolvable:$false] %s501_s18 }
  0x20   : > { %s503_s19 = scalar_lea.vmem %s502_s18, 256  ;;  %p504_p11 = scmp.lt.s32.totalorder %s682_s29, %s502_s18 }
  0x21   : > { %p499_p0 = pnand %p497_p12, %p483_p13  ;;  %p505_p2 = scmp.lt.s32.totalorder %s503_s19, %s496_s15 }
  0x23   : > { %p500_p10 = pneg %p499_p0  ;;  %p506_p3 = por %p505_p2, %p504_p11 }
  0x25   : > { %p507_p4 = pnand %p506_p3, %p500_p10 }
  0x27   : > { %510 = shalt.err (!%p507_p4)
}
  0x28   : > { %427 = dma.hbm_to_vmem [thread:$0]  (!%p678_p9), %s674_s27, 128, %s682_s29, %s142_s3  }
  0x29   : > { %p788_p1 = scmp.lt.s32.totalorder %s595_s14, 3  ;;  %p789_p5 = scmp.ge.s32.totalorder %s595_s14, 1 }
  0x2a   : > { %s405_s24 = sshll.u32 %s667_s22, 1  ;;  %s419_s25 = sshll.u32 %s591_s13, 5 }
  0x2b   : > { %p716_p6 = pnand %p789_p5, %p788_p1  ;;  %s725_s4 = scalar_lea.hbm %s782_s1, %s419_s25 }
  0x2c   : > { %s168_s5 = scalar_lea.vmem [#allocation5], %s405_s24  ;;  %s165_s27 = scalar_lea.sflag [#allocation6], %s667_s22 }
  0x2d   : > { %s790_s23 = scalar_select %p716_p6, 1, 0 }
  0x2e   : > { %s178_s6 = sshll.u32 %s168_s5, 4  ;;  %s511_s29 = scalar_lea.hbm %s725_s4, 32  ;;  %s179_s6 = int_to_ptr.vmem [resolvable:$true] %s178_s6 }
  0x2f   : > { %p512_p10 = scmp.ne.s32.totalorder %s725_s4, %s511_s29  ;;  %s516_s8 = scalar_lea.hbm %s782_s1, 64 }
  0x30   : > { %p517_p12 = scmp.lt.u32.totalorder %s725_s4, %s782_s1  ;;  %p518_p0 = scmp.lt.u32.totalorder %s516_s8, %s511_s29 }
  0x31   : > { %p514_p11 = pnand %p512_p10, %p483_p13  ;;  %p520_p3 = scmp.lt.u32.totalorder %s511_s29, %s725_s4 }
  0x32   : > { %p519_p2 = por %p518_p0, %p517_p12 }
  0x33   : > { %p515_p8 = pneg %p514_p11 }
  0x34   : > { %p521_p4 = por %p520_p3, %p519_p2 }
  0x36   : > { %p522_p1 = pnand %p521_p4, %p515_p8 }
  0x38   : > { %525 = shalt.err (!%p522_p1)
}
  0x39   : > { %s526_s22 = scalar_lea.vmem %s179_s6, 32  ;;  %s598_s17 = smov [#allocation5]  }
  0x3a   : > { %p527_p5 = scmp.ne.s32.totalorder %s179_s6, %s526_s22  ;;  %s531_s18 = sshll.u32 %s598_s17, 4  ;;  %s532_s18 = int_to_ptr.vmem [resolvable:$false] %s531_s18 }
  0x3b   : > { %s533_s19 = scalar_lea.vmem %s532_s18, 64  ;;  %p534_p7 = scmp.lt.s32.totalorder %s179_s6, %s532_s18 }
  0x3c   : > { %p529_p10 = pnand %p527_p5, %p483_p13  ;;  %p535_p6 = scmp.lt.s32.totalorder %s533_s19, %s526_s22 }
  0x3e   : > { %p530_p11 = pneg %p529_p10  ;;  %p536_p0 = por %p535_p6, %p534_p7 }
  0x40   : > { %p537_p12 = pnand %p536_p0, %p530_p11 }
  0x42   : > { %540 = shalt.err (!%p537_p12)
}
  0x43   : > { %430 = dma.hbm_to_vmem [thread:$0]  (!%p678_p9), %s725_s4, 32, %s179_s6, %s165_s27  }
  0x44   : > { %p791_p8 = scmp.ne.s32.totalorder %s790_s23, 0 }
  0x45   : > { %s189_s24 = sand.u32 (!%p791_p8), 1, %s579_s10   ;;  %p792_p13 = scmp.ne.s32.totalorder (!%p791_p8), %s786_s20, 0 }
  0x46   : > { %187 = sbr.rel (%p791_p8) target bundleno = 256 (0x100), region = 28  ;;  %s409_s25 = sshll.u32 (!%p791_p8), %s189_s24, 3 }
  0x47   : > { %s190_s26 = scalar_lea.sflag (!%p791_p8), [#allocation4], %s189_s24  ;;  %s193_s28 = scalar_lea.vmem (!%p791_p8), [#allocation3], %s409_s25 }
  0x4d   : > { %566 = dma.done.wait (%p792_p13), %s190_s26, 128  }
  0x4e   : > { %568 = vsyncadd (%p792_p13), %s190_s26, 4294967168  ;;  %s410_s5 = sshll.u32 %s189_s24, 1  ;;  %s199_s29 = scalar_lea.sflag [#allocation6], %s189_s24 }
  0x4f   : > { %s202_s30 = scalar_lea.vmem [#allocation5], %s410_s5 }
  0x50   : > { %570 = dma.done.wait (%p792_p13), %s199_s29, 32  }
  0x51   : > { %572 = vsyncadd (%p792_p13), %s199_s29, 4294967264  ;;  %v599_v0 = vmov 0.0   ;;  %v245_v1 = vld [vmem:[%s193_s28] sm:$0xf]  ;;  %v412_v2 = vld [vmem:[%s202_s30] ss:$0 sm:$0xff] }
  0x52   : > { %243 = vst [vmem:[#allocation2] sm:$0xf] %v599_v0  ;;  %v253_v4 = vmul.f32 %v412_v2, %v245_v1  ;;  %v413_v6 = vld [vmem:[%s193_s28 + $0x4] sm:$0xf]  ;;  %v415_v7 = vld [vmem:[%s202_s30 + $0x1] ss:$0 sm:$0xff] }
  0x53   : > { %v267_v8 = vmul.f32 %v415_v7, %v413_v6  ;;  %vm274_vm0 = vcmask 1043456   ;;  %p232_p7 = scmp.lt.s32.totalorder %s587_s12, 1  ;;  %vm279_vm1 = vcmask 3072  }
  0x55   : > { %s801_s12 = smov (!%p232_p7, %s587_s12), 1 }
  0x56   : > { %s411_s20 = sshll.u32 %s801_s12, 2 }
  0x57   : > { %s238_s6 = scalar_lea.vmem %s783_s2, %s411_s20 }
  0x59   : > { %v244_v3 = vld [vmem:[#allocation2] sm:$0xf] }
  0x5a   : > { %v254_v5 = vadd.f32 %v253_v4, %v244_v3 }
  0x5c   : > { %255 = vst [vmem:[#allocation2] sm:$0xf] %v254_v5 }
  0x63   : > { %v256_v9 = vld [vmem:[#allocation2] sm:$0xf] }
  0x64   : > { %v268_v10 = vadd.f32 %v267_v8, %v256_v9 }
  0x66   : > { %269 = vst [vmem:[#allocation2] sm:$0xf] %v268_v10 }
  0x6d   : > { %v273_v11 = vld [vmem:[#allocation2] sm:$0xf] }
  0x6e   : > { %v275_v12 = vsel %vm274_vm0, %v273_v11, 0.0 }
  0x6f   : > { %276 = vadd.xlane.f32.xlu0 %v275_v12 }
  0xfc   : > { %v277_v13 = vpop.xlane.xlu0 %276 }
  0xfd   : > { %v278_v14 = vmul.f32 0.00390625, %v277_v13 }
  0xff   : > { %280 = vst.msk [vmem:[%s238_s6] sm:$0xf] %vm279_vm1, %v278_v14 }
 0x100 PF: > { %s18_s14 = sadd.s32 1, %s595_s14   ;;  %s793_s9 = smov %s579_s10 }
 0x101   : > { %p15_p9 = scmp.ge.s32.totalorder %s18_s14, 4   ;;  %s794_s10 = smov %s583_s11 }
 0x102   : > { %s795_s11 = smov %s664_s21  ;;  %s796_s12 = smov %s591_s13 }
 0x103   : > { %s797_s13 = smov %s799_s16  ;;  %17 = sbr.rel (!%p15_p9) target bundleno = 6 (0x6), region = 91 }
 0x10a   :  { %306 = vsyncpa [#allocation4], 1 }
 0x10b   :  { %308 = vsyncpa [#allocation4 + $0x1], 1 }
 0x10c   :  { %309 = vsyncpa [#allocation6], 1 }
 0x10d   :  { %311 = vsyncpa [#allocation6 + $0x1], 1 }

</bundles_post_ra>
